<compile_context>
chip_gen: v5e
topology: v5e:2x2
jax: 0.10.0
libtpu: 0.0.40
codegen_flags: <defaults>
</compile_context>

<pallas_src>
import functools

import jax
import jax.numpy as jnp
from jax.experimental import pallas as pl
from jax.experimental.pallas import tpu as pltpu

_LANE = 128


def _masked_loss_kernel(mask_ref, pred_ref, tgt_ref, stn_ref,
                        comb_ref, cnt_ref, *, tau, mae_w, qtl_w):
    """Grid = (batch_tiles, spatial_tiles); spatial axis is a reduction.

    mask_ref : (1, TC)    flattened domain-mask chunk (shared across batch)
    pred_ref : (TB, TC)   model output chunk
    tgt_ref  : (TB, TC)   target chunk
    stn_ref  : (TB, TC)   station-mask chunk
    comb_ref : (TB, 128)  per-sample per-lane partial sums of combined loss
    cnt_ref  : (TB, 128)  per-sample per-lane partial counts of valid pixels
    """
    # Zero the resident accumulators at the start of the spatial reduction.
    @pl.when(pl.program_id(1) == 0)
    def _():
        comb_ref[...] = jnp.zeros_like(comb_ref)
        cnt_ref[...] = jnp.zeros_like(cnt_ref)

    mask = mask_ref[...].astype(jnp.float32)    # (1, TC)
    pred = pred_ref[...].astype(jnp.float32)    # (TB, TC)
    tgt = tgt_ref[...].astype(jnp.float32)
    stn = stn_ref[...].astype(jnp.float32)

    valid = jnp.where((mask == 1.0) & (stn == 0.0), 1.0, 0.0)   # (TB, TC)

    err = tgt - pred
    abs_err = jnp.abs(err)
    q_err = jnp.maximum(tau * err, (tau - 1.0) * err)           # pinball loss
    contrib = (mae_w * abs_err + qtl_w * q_err) * valid         # fused terms

    # Fold the TC lanes down to 128-lane partial sums (VALU adds only; the
    # final cross-lane reduce is done by the wrapper in plain JAX).
    tb, tc = contrib.shape
    comb_part = jnp.zeros((tb, _LANE), jnp.float32)
    cnt_part = jnp.zeros((tb, _LANE), jnp.float32)
    for j in range(tc // _LANE):
        sl = slice(j * _LANE, (j + 1) * _LANE)
        comb_part = comb_part + contrib[:, sl]
        cnt_part = cnt_part + valid[:, sl]

    comb_ref[...] += comb_part
    cnt_ref[...] += cnt_part


def masked_combined_mae_quantile_loss(pred, target, station_mask, mask_2d,
                                      tau=0.95, mae_weight=0.5,
                                      quantile_weight=0.5, reduction='mean'):
    """JAX/Pallas equivalent of MaskedCombinedMAEQuantileLoss.forward.

    pred, target, station_mask: [B, 1, H, W]   (NCHW, single channel)
    mask_2d:                    [H, W]
    """
    assert reduction in ('mean', 'none', 'global')
    B, C, H, W = pred.shape
    assert C == 1
    N = H * W

    # Spatial tiling: lane-dense chunks, TC a multiple of 128 that divides the
    # padded length.  Padded pixels carry mask=0 so they never count as valid.
    n128 = ((N + _LANE - 1) // _LANE) * _LANE
    TC = min(n128, 2048)
    N_pad = ((n128 + TC - 1) // TC) * TC

    # Batch tiling: 8-row sublane-aligned blocks when possible, otherwise one
    # full-batch block (block dim == full array dim satisfies the (8,128) rule).
    if B >= 8:
        TB = 8
        B_pad = ((B + 7) // 8) * 8
    else:
        TB = B
        B_pad = B

    def flat_pad(x):
        x2 = x.reshape(B, N)
        if B_pad == B and N_pad == N:
            return x2
        return jnp.pad(x2, ((0, B_pad - B), (0, N_pad - N)))

    pred2 = flat_pad(pred)          # native dtype; cast happens in-kernel
    tgt2 = flat_pad(target)
    stn2 = flat_pad(station_mask)
    mask2 = mask_2d.reshape(1, N)
    if N_pad != N:
        mask2 = jnp.pad(mask2, ((0, 0), (0, N_pad - N)))

    kernel = functools.partial(
        _masked_loss_kernel,
        tau=float(tau), mae_w=float(mae_weight), qtl_w=float(quantile_weight))

    sample_spec = pl.BlockSpec((TB, TC), lambda bi, ci: (bi, ci))
    out_spec = pl.BlockSpec((TB, _LANE), lambda bi, ci: (bi, 0))

    comb_p, cnt_p = pl.pallas_call(
        kernel,
        out_shape=(
            jax.ShapeDtypeStruct((B_pad, _LANE), jnp.float32),
            jax.ShapeDtypeStruct((B_pad, _LANE), jnp.float32),
        ),
        grid_spec=pltpu.PrefetchScalarGridSpec(
            num_scalar_prefetch=0,
            grid=(B_pad // TB, N_pad // TC),
            in_specs=[
                pl.BlockSpec((1, TC), lambda bi, ci: (0, ci)),   # domain mask
                sample_spec,                                     # pred
                sample_spec,                                     # target
                sample_spec,                                     # station mask
            ],
            out_specs=[out_spec, out_spec],
        ),
        compiler_params=pltpu.CompilerParams(
            dimension_semantics=("parallel", "arbitrary")),
    )(mask2, pred2, tgt2, stn2)

    comb_sum = comb_p[:B].sum(axis=-1)                    # per-sample weighted sum
    cnt = jnp.maximum(cnt_p[:B].sum(axis=-1), 1.0)        # per-sample clamped count

    if reduction == 'none':
        return comb_sum / cnt
    elif reduction == 'mean':
        return (comb_sum / cnt).mean()
    else:  # 'global'
        return comb_sum.sum() / jnp.maximum(cnt.sum(), 1.0)


def _reference_loss(pred, target, station_mask, mask_2d, tau, mae_weight,
                    quantile_weight, reduction):
    """Pure-JAX reference mirroring the PyTorch forward, for verification."""
    B = pred.shape[0]
    pred = pred.astype(jnp.float32)
    target = target.astype(jnp.float32)
    station_mask = station_mask.astype(jnp.float32)
    mask = mask_2d[None, None].astype(jnp.float32)
    valid = ((mask == 1.0) & (station_mask == 0.0)).astype(jnp.float32)
    abs_err = jnp.abs(pred - target)
    err = target - pred
    q_err = jnp.maximum(tau * err, (tau - 1.0) * err)
    mae_sum = (abs_err * valid).reshape(B, -1).sum(axis=1)
    qtl_sum = (q_err * valid).reshape(B, -1).sum(axis=1)
    cnt = jnp.maximum(valid.reshape(B, -1).sum(axis=1), 1.0)
    combined = mae_weight * mae_sum / cnt + quantile_weight * qtl_sum / cnt
    if reduction == 'none':
        return combined
    if reduction == 'mean':
        return combined.mean()
    return (mae_weight * mae_sum.sum() + quantile_weight * qtl_sum.sum()) / \
        jnp.maximum(cnt.sum(), 1.0)


if __name__ == "__main__":
    tau, mae_w, qtl_w = 0.95, 0.5, 0.5
    key = jax.random.PRNGKey(0)

    # Two configs: small batch (TB == B path) and B/H*W that exercise padding.
    configs = [(2, 16, 16), (9, 20, 20)]
    for B, H, W in configs:
        key, k1, k2, k3, k4 = jax.random.split(key, 5)
        pred = jax.random.normal(k1, (B, 1, H, W), dtype=jnp.float32)
        target = jax.random.normal(k2, (B, 1, H, W), dtype=jnp.float32)
        # sparse station mask (~10% of pixels are stations)
        station_mask = (jax.random.uniform(k3, (B, 1, H, W)) < 0.1).astype(jnp.float32)
        # deterministic domain mask buffer (~80% in-domain)
        mask_2d = (jax.random.uniform(k4, (H, W)) < 0.8).astype(jnp.float32)

        for red in ('mean', 'none', 'global'):
            out = masked_combined_mae_quantile_loss(
                pred, target, station_mask, mask_2d,
                tau=tau, mae_weight=mae_w, quantile_weight=qtl_w, reduction=red)
            out = jax.block_until_ready(out)
            ref = _reference_loss(pred, target, station_mask, mask_2d,
                                  tau, mae_w, qtl_w, red)
            assert jnp.allclose(out, ref, rtol=1e-5, atol=1e-5), \
                (B, H, W, red, out, ref)

    print("KERNEL_OK")
</pallas_src>

<mosaic_0001>
module attributes {stable_mosaic.version = 11 : i64} {
  func.func @_masked_loss_kernel(%arg0: i32, %arg1: i32, %arg2: memref<1x256xf32, #tpu.memory_space<vmem>>, %arg3: memref<2x256xf32, #tpu.memory_space<vmem>>, %arg4: memref<2x256xf32, #tpu.memory_space<vmem>>, %arg5: memref<2x256xf32, #tpu.memory_space<vmem>>, %arg6: memref<2x128xf32, #tpu.memory_space<vmem>>, %arg7: memref<2x128xf32, #tpu.memory_space<vmem>>) attributes {dimension_semantics = [#tpu.dimension_semantics<parallel>, #tpu.dimension_semantics<arbitrary>], iteration_bounds = array<i64: 1, 1>, scalar_prefetch = 0 : i64, scratch_operands = 0 : i64, tpu.core_type = #tpu.core_type<tc>, window_params = [{transform_indices = @transform_0, window_bounds = array<i64: 1, 256>}, {transform_indices = @transform_1, window_bounds = array<i64: 2, 256>}, {transform_indices = @transform_2, window_bounds = array<i64: 2, 256>}, {transform_indices = @transform_3, window_bounds = array<i64: 2, 256>}, {transform_indices = @transform_4, window_bounds = array<i64: 2, 128>}, {transform_indices = @transform_5, window_bounds = array<i64: 2, 128>}]} {
    %c0_i32 = arith.constant 0 : i32
    %0 = arith.cmpi eq, %arg1, %c0_i32 : i32
    %1 = arith.extui %0 : i1 to i32
    %c0_i32_0 = arith.constant 0 : i32
    %2 = arith.cmpi ne, %1, %c0_i32_0 : i32
    scf.if %2 {
      %cst_25 = arith.constant 0.000000e+00 : f32
      %45 = vector.broadcast %cst_25 : f32 to vector<2x128xf32>
      %c0_26 = arith.constant 0 : index
      %c0_27 = arith.constant 0 : index
      %46 = vector.load %arg6[%c0_26, %c0_27] : memref<2x128xf32, #tpu.memory_space<vmem>>, vector<2x128xf32>
      tpu.vector_store %arg6[%c0_26, %c0_27], %45 {strides = array<i32>} : memref<2x128xf32, #tpu.memory_space<vmem>>, vector<2x128xf32>,
      %cst_28 = arith.constant 0.000000e+00 : f32
      %47 = vector.broadcast %cst_28 : f32 to vector<2x128xf32>
      %c0_29 = arith.constant 0 : index
      %c0_30 = arith.constant 0 : index
      %48 = vector.load %arg7[%c0_29, %c0_30] : memref<2x128xf32, #tpu.memory_space<vmem>>, vector<2x128xf32>
      tpu.vector_store %arg7[%c0_29, %c0_30], %47 {strides = array<i32>} : memref<2x128xf32, #tpu.memory_space<vmem>>, vector<2x128xf32>,
    } else {
    }
    %c0 = arith.constant 0 : index
    %c0_1 = arith.constant 0 : index
    %3 = vector.load %arg2[%c0, %c0_1] : memref<1x256xf32, #tpu.memory_space<vmem>>, vector<1x256xf32>
    %c0_2 = arith.constant 0 : index
    %c0_3 = arith.constant 0 : index
    %4 = vector.load %arg3[%c0_2, %c0_3] : memref<2x256xf32, #tpu.memory_space<vmem>>, vector<2x256xf32>
    %c0_4 = arith.constant 0 : index
    %c0_5 = arith.constant 0 : index
    %5 = vector.load %arg4[%c0_4, %c0_5] : memref<2x256xf32, #tpu.memory_space<vmem>>, vector<2x256xf32>
    %c0_6 = arith.constant 0 : index
    %c0_7 = arith.constant 0 : index
    %6 = vector.load %arg5[%c0_6, %c0_7] : memref<2x256xf32, #tpu.memory_space<vmem>>, vector<2x256xf32>
    %cst = arith.constant 1.000000e+00 : f32
    %7 = vector.broadcast %cst : f32 to vector<1x256xf32>
    %8 = arith.cmpf oeq, %3, %7 : vector<1x256xf32>
    %cst_8 = arith.constant 0.000000e+00 : f32
    %9 = vector.broadcast %cst_8 : f32 to vector<2x256xf32>
    %10 = arith.cmpf oeq, %6, %9 : vector<2x256xf32>
    %11 = vector.broadcast %8 : vector<1x256xi1> to vector<2x256xi1>
    %12 = arith.andi %11, %10 : vector<2x256xi1>
    %cst_9 = arith.constant 1.000000e+00 : f32
    %cst_10 = arith.constant 0.000000e+00 : f32
    %13 = vector.broadcast %cst_9 : f32 to vector<2x256xf32>
    %14 = vector.broadcast %cst_10 : f32 to vector<2x256xf32>
    %15 = arith.select %12, %13, %14 : vector<2x256xi1>, vector<2x256xf32>
    %16 = arith.subf %5, %4 : vector<2x256xf32>
    %17 = math.absf %16 : vector<2x256xf32>
    %cst_11 = arith.constant 0.949999988 : f32
    %18 = vector.broadcast %cst_11 : f32 to vector<2x256xf32>
    %19 = arith.mulf %18, %16 : vector<2x256xf32>
    %cst_12 = arith.constant -5.000000e-02 : f32
    %20 = vector.broadcast %cst_12 : f32 to vector<2x256xf32>
    %21 = arith.mulf %20, %16 : vector<2x256xf32>
    %22 = arith.maximumf %19, %21 : vector<2x256xf32>
    %cst_13 = arith.constant 5.000000e-01 : f32
    %23 = vector.broadcast %cst_13 : f32 to vector<2x256xf32>
    %24 = arith.mulf %23, %17 : vector<2x256xf32>
    %cst_14 = arith.constant 5.000000e-01 : f32
    %25 = vector.broadcast %cst_14 : f32 to vector<2x256xf32>
    %26 = arith.mulf %25, %22 : vector<2x256xf32>
    %27 = arith.addf %24, %26 : vector<2x256xf32>
    %28 = arith.mulf %27, %15 : vector<2x256xf32>
    %cst_15 = arith.constant 0.000000e+00 : f32
    %29 = vector.broadcast %cst_15 : f32 to vector<2x128xf32>
    %cst_16 = arith.constant 0.000000e+00 : f32
    %30 = vector.broadcast %cst_16 : f32 to vector<2x128xf32>
    %31 = vector.extract_strided_slice %28 {offsets = [0, 0], sizes = [2, 128], strides = [1, 1]} : vector<2x256xf32> to vector<2x128xf32>
    %32 = arith.addf %29, %31 : vector<2x128xf32>
    %33 = vector.extract_strided_slice %15 {offsets = [0, 0], sizes = [2, 128], strides = [1, 1]} : vector<2x256xf32> to vector<2x128xf32>
    %34 = arith.addf %30, %33 : vector<2x128xf32>
    %35 = vector.extract_strided_slice %28 {offsets = [0, 128], sizes = [2, 128], strides = [1, 1]} : vector<2x256xf32> to vector<2x128xf32>
    %36 = arith.addf %32, %35 : vector<2x128xf32>
    %37 = vector.extract_strided_slice %15 {offsets = [0, 128], sizes = [2, 128], strides = [1, 1]} : vector<2x256xf32> to vector<2x128xf32>
    %38 = arith.addf %34, %37 : vector<2x128xf32>
    %c0_17 = arith.constant 0 : index
    %c0_18 = arith.constant 0 : index
    %39 = vector.load %arg6[%c0_17, %c0_18] : memref<2x128xf32, #tpu.memory_space<vmem>>, vector<2x128xf32>
    %40 = arith.addf %39, %36 : vector<2x128xf32>
    %c0_19 = arith.constant 0 : index
    %c0_20 = arith.constant 0 : index
    %41 = vector.load %arg6[%c0_19, %c0_20] : memref<2x128xf32, #tpu.memory_space<vmem>>, vector<2x128xf32>
    tpu.vector_store %arg6[%c0_19, %c0_20], %40 {strides = array<i32>} : memref<2x128xf32, #tpu.memory_space<vmem>>, vector<2x128xf32>,
    %c0_21 = arith.constant 0 : index
    %c0_22 = arith.constant 0 : index
    %42 = vector.load %arg7[%c0_21, %c0_22] : memref<2x128xf32, #tpu.memory_space<vmem>>, vector<2x128xf32>
    %43 = arith.addf %42, %38 : vector<2x128xf32>
    %c0_23 = arith.constant 0 : index
    %c0_24 = arith.constant 0 : index
    %44 = vector.load %arg7[%c0_23, %c0_24] : memref<2x128xf32, #tpu.memory_space<vmem>>, vector<2x128xf32>
    tpu.vector_store %arg7[%c0_23, %c0_24], %43 {strides = array<i32>} : memref<2x128xf32, #tpu.memory_space<vmem>>, vector<2x128xf32>,
    return
  }
  func.func @transform_0(%arg0: i32, %arg1: i32) -> (i32, i32) {
    %c0_i32 = arith.constant 0 : i32
    %c0_i32_0 = arith.constant 0 : i32
    return %c0_i32, %arg1 : i32, i32
  }
  func.func @transform_1(%arg0: i32, %arg1: i32) -> (i32, i32) {
    %c0_i32 = arith.constant 0 : i32
    return %arg0, %arg1 : i32, i32
  }
  func.func @transform_2(%arg0: i32, %arg1: i32) -> (i32, i32) {
    %c0_i32 = arith.constant 0 : i32
    return %arg0, %arg1 : i32, i32
  }
  func.func @transform_3(%arg0: i32, %arg1: i32) -> (i32, i32) {
    %c0_i32 = arith.constant 0 : i32
    return %arg0, %arg1 : i32, i32
  }
  func.func @transform_4(%arg0: i32, %arg1: i32) -> (i32, i32) {
    %c0_i32 = arith.constant 0 : i32
    %c0_i32_0 = arith.constant 0 : i32
    return %arg0, %c0_i32 : i32, i32
  }
  func.func @transform_5(%arg0: i32, %arg1: i32) -> (i32, i32) {
    %c0_i32 = arith.constant 0 : i32
    %c0_i32_0 = arith.constant 0 : i32
    return %arg0, %c0_i32 : i32, i32
  }
}

</mosaic_0001>

<bundles_post_ra>
// kernel: tpu_custom_call.1
= control target key start
LH: loop header
LB: loop body
LE: loop exit
PB: predicated region body
PF: predicated region fallthrough
CT: control target
= control target key end

     0   :  { %11 = vsyncpa [#allocation3], 0  ;;  %s384_s0 = inlined_call_operand.hbm [shape: f32[1,256], index: 0, kind: input, shape index: {}]   ;;  %s385_s1 = inlined_call_operand.hbm [shape: f32[2,256], index: 1, kind: input, shape index: {}]   ;;  %s386_s2 = inlined_call_operand.hbm [shape: f32[2,256], index: 2, kind: input, shape index: {}]   ;;  %s387_s3 = inlined_call_operand.hbm [shape: f32[2,256], index: 3, kind: input, shape index: {}]   ;;  %s388_s4 = inlined_call_operand.hbm [shape: f32[2,128], index: 4, kind: output, shape index: {0}]   ;;  %s389_s5 = inlined_call_operand.hbm [shape: f32[2,128], index: 5, kind: output, shape index: {1}]  }
   0x1   :  { %12 = vsyncpa [#allocation6], 0 }
   0x2   :  { %13 = vsyncpa [#allocation9], 0 }
   0x3   :  { %14 = vsyncpa [#allocation4], 0  ;;  %s32_s20 = sshll.u32 %s385_s1, 4  ;;  %s33_s20 = int_to_ptr.hbm [resolvable:$true] %s32_s20 }
   0x4   :  { %15 = vsyncpa [#allocation12], 0  ;;  %s328_s21 = smov [#allocation5]   ;;  %s21_s25 = sshll.u32 %s384_s0, 4  ;;  %s22_s25 = int_to_ptr.hbm [resolvable:$true] %s21_s25 }
   0x5   :  { %s34_s22 = sshll.u32 %s328_s21, 4  ;;  %s329_s26 = smov [#allocation2]   ;;  %s35_s22 = int_to_ptr.vmem [resolvable:$true] %s34_s22 }
   0x6   :  { %37 = dma.hbm_to_vmem [thread:$0]  %s33_s20, 64, %s35_s22, [#allocation6]  }
   0x7   :  { %s23_s27 = sshll.u32 %s329_s26, 4  ;;  %s43_s30 = sshll.u32 %s386_s2, 4  ;;  %s24_s27 = int_to_ptr.vmem [resolvable:$true] %s23_s27  ;;  %s44_s30 = int_to_ptr.hbm [resolvable:$true] %s43_s30 }
   0x8   :  { %26 = dma.hbm_to_vmem [thread:$0]  %s22_s25, 32, %s24_s27, [#allocation3]  }
   0x9   :  { %s54_s7 = sshll.u32 %s387_s3, 4  ;;  %s330_s8 = smov [#allocation7]   ;;  %s55_s7 = int_to_ptr.hbm [resolvable:$true] %s54_s7 }
   0xa   :  { %s45_s9 = sshll.u32 %s330_s8, 4  ;;  %s331_s0 = smov [#allocation8]   ;;  %s46_s9 = int_to_ptr.vmem [resolvable:$true] %s45_s9 }
   0xb   :  { %48 = dma.hbm_to_vmem [thread:$0]  %s44_s30, 64, %s46_s9, [#allocation6]  }
   0xc   :  { %s56_s10 = sshll.u32 %s331_s0, 4  ;;  %s57_s10 = int_to_ptr.vmem [resolvable:$true] %s56_s10 }
   0xd   :  { %59 = dma.hbm_to_vmem [thread:$0]  %s55_s7, 64, %s57_s10, [#allocation9]  }
   0xe   :  { %318 = dma.done.wait [#allocation3], 32  }
   0xf   :  { %319 = vsyncadd [#allocation3], 4294967264 }
  0x10   :  { %320 = dma.done.wait [#allocation6], 128  }
  0x11   :  { %321 = vsyncadd [#allocation6], 4294967168 }
  0x12   :  { %322 = dma.done.wait [#allocation9], 64  }
  0x13   :  { %323 = vsyncadd [#allocation9], 4294967232  ;;  %v332_v0 = vmov 0.0   ;;  %v82_v1 = vld [vmem:[#allocation2] sm:$0x3]  ;;  %v333_v5 = vmov 0  }
  0x14   :  { %81 = vst [vmem:[#allocation11] sm:$0x3] %v332_v0  ;;  %v85_v2 = vld [vmem:[#allocation8] sm:$0xf]  ;;  %v83_v3 = vld [vmem:[#allocation5] sm:$0xf] }
  0x15   :  { %80 = vst [vmem:[#allocation10] sm:$0x3] %v332_v0  ;;  %vm86_vm0 = vcmp.eq.f32.partialorder %v82_v1, 1.0  ;;  %vm87_vm1 = vcmp.eq.f32.partialorder %v85_v2, 0.0  ;;  %v84_v4 = vld [vmem:[#allocation7] sm:$0xf] }
  0x16   :  { %v88_v6 = vsel %vm86_vm0, 1, %v333_v5  ;;  %v93_v7 = vsel %vm87_vm1, 1, %v333_v5  ;;  %v103_v8 = vsub.f32 %v84_v4, %v83_v3  ;;  %vm114_vm8 = vcmask 1041408   ;;  %s334_s2 = smov [#allocation11]   ;;  %s149_s13 = sshll.u32 %s389_s5, 4  ;;  %s150_s13 = int_to_ptr.hbm [resolvable:$true] %s149_s13 }
  0x17   :  { %94 = vst [vmem:[#allocation1] ss:$4 sm:$0xff] %v93_v7  ;;  %v89_v11 = vperm.slane %v88_v6, 0  ;;  %v90_v12 = vperm.slane %v88_v6, 1  ;;  %s147_s3 = sshll.u32 %s334_s2, 4  ;;  %s335_s14 = smov [#allocation10]   ;;  %s148_s3 = int_to_ptr.vmem [resolvable:$true] %s147_s3 }
  0x18   :  { %v105_v9 = vmul.f32 0.95, %v103_v8  ;;  %v106_v10 = vmul.f32 -0.05, %v103_v8  ;;  %v104_v13 = vand.u32 2147483647, %v103_v8 }
  0x19   :  { %vm91_vm2 = vcmp.eq.s32.totalorder %v89_v11, 1  ;;  %vm92_vm3 = vcmp.eq.s32.totalorder %v90_v12, 1  ;;  %s136_s15 = sshll.u32 %s335_s14, 4  ;;  %s138_s18 = sshll.u32 %s388_s4, 4  ;;  %s137_s15 = int_to_ptr.vmem [resolvable:$true] %s136_s15  ;;  %s139_s18 = int_to_ptr.hbm [resolvable:$true] %s138_s18 }
  0x1a   :  { %v107_v14 = vmax.f32 %v105_v9, %v106_v10  ;;  %v108_v15 = vmul.f32 0.5, %v104_v13 }
  0x1b   :  { %v128_v21 = vld [vmem:[#allocation11] sm:$0x3] }
  0x1c   :  { %v109_v16 = vmul.f32 0.5, %v107_v14  ;;  %v125_v29 = vld [vmem:[#allocation10] sm:$0x3] }
  0x1e   :  { %v95_v17 = vld.sshfl [vmem:[#allocation1] sm:$0xff pattern:$0x73625140]  ;;  %v96_v18 = vld.sshfl [vmem:[#allocation1 + $0x8] sm:$0xff pattern:$0x73625140]  ;;  %v110_v22 = vadd.f32 %v109_v16, %v108_v15 }
  0x1f   :  { %vm97_vm4 = vcmp.ne.s32.totalorder %v95_v17, 0  ;;  %vm98_vm5 = vcmp.ne.s32.totalorder %v96_v18, 0 }
  0x20   :  { %vm99_vm6 = vmand %vm91_vm2, %vm97_vm4 }
  0x21   :  { %vm100_vm7 = vmand %vm92_vm3, %vm98_vm5  ;;  %v101_v19 = vsel %vm99_vm6, 1.0, %v332_v0 }
  0x22   :  { %v102_v20 = vsel %vm100_vm7, 1.0, %v332_v0 }
  0x23   :  { %v113_v23 = vrot.slane %v102_v20, 6  ;;  %v124_v24 = vadd.f32 %v102_v20, %v101_v19 }
  0x25   :  { %v129_v25 = vadd.f32 %v128_v21, %v124_v24  ;;  %v115_v26 = vsel %vm114_vm8, %v101_v19, %v113_v23 }
  0x26   :  { %v117_v27 = vmul.f32 %v115_v26, %v110_v22 }
  0x27   :  { %130 = vst [vmem:[#allocation11] sm:$0x3] %v129_v25 }
  0x28   :  { %v121_v28 = vrot.slane %v117_v27, 2  ;;  %152 = dma.vmem_to_hbm [thread:$0]  %s148_s3, 32, %s150_s13, [#allocation12]  }
  0x2a   :  { %v123_v30 = vadd.f32 %v121_v28, %v117_v27 }
  0x2c   :  { %v126_v31 = vadd.f32 %v125_v29, %v123_v30 }
  0x2e   :  { %127 = vst [vmem:[#allocation10] sm:$0x3] %v126_v31 }
  0x2f   :  { %141 = dma.vmem_to_hbm [thread:$0]  %s137_s15, 32, %s139_s18, [#allocation4]  }
  0x30   :  { %324 = dma.done.wait [#allocation4], 32  }
  0x31   :  { %325 = vsyncadd [#allocation4], 4294967264 }
  0x32   :  { %326 = dma.done.wait [#allocation12], 32  }
  0x33   :  { %327 = vsyncadd [#allocation12], 4294967264 }
  0x34   :  { %161 = vsyncpa [#allocation3], 1 }
  0x35   :  { %162 = vsyncpa [#allocation6], 1 }
  0x36   :  { %163 = vsyncpa [#allocation9], 1 }
  0x37   :  { %164 = vsyncpa [#allocation4], 1 }
  0x38   :  { %165 = vsyncpa [#allocation12], 1 }

</bundles_post_ra>
